<compile_context>
chip_gen: v6e
topology: v6e:2x2x1
jax: 0.10.0
libtpu: 0.0.40
codegen_flags: <defaults>
</compile_context>

<pallas_src>
import jax
import jax.numpy as jnp
from jax.experimental import pallas as pl
from jax.experimental.pallas import tpu as pltpu

# ----------------------------- problem sizes -----------------------------
N = 2                      # batch
C_IN = 4                   # in_channels
C_OUT = 8                  # out_channels
C_MID = C_OUT // 2         # 4
C_CAT = 4 * C_MID          # 16 (concat of the four branches)
H = W = 16
PAD = 5                    # max padding over all branches (dilation-5 branch)
M_TOT = N * H * W          # 512 pixels, batch folded into the lane axis
NTAPS = 1 + 3 * 9          # 28 taps total
K_RAW = NTAPS * C_IN       # 112
KP = 128                   # contraction dim padded to a full lane width
EPS = 1e-5
DILATIONS = (2, 5, 1)      # conv_3x3_1, conv_3x3_2, conv_3x3_3 (cat order)


# ------------------------------- kernel ----------------------------------
def aspp_kernel(pT_ref, w1_ref, w2_ref, t2_ref, o_ref):
    """Single invocation, whole problem resident in VMEM.

    pT_ref: (KP, M_TOT)  bf16  transposed im2col patches; row K_RAW == 1.0
    w1_ref: (C_CAT, KP)  bf16  fused branch weights, BN scale folded into rows,
                               BN shift folded into column K_RAW
    w2_ref: (C_OUT, C_CAT) f32 final 1x1 conv weight, final-BN scale folded in
    t2_ref: (C_OUT, 1)   f32   folded final-BN shift
    o_ref:  (C_OUT, M_TOT) f32 lane-dense output (transposed NCHW, batch folded)
    """
    # Branch convs + BN (scale & shift already folded) + ReLU:
    # one (16,128) x (128,512) bf16 MXU matmul, f32 accumulation.
    mid = jnp.dot(w1_ref[...], pT_ref[...], preferred_element_type=jnp.float32)
    mid = jnp.maximum(mid, 0.0)                                   # (C_CAT, M_TOT)

    # Final 1x1 conv + BN + ReLU: (8,16) x (16,512).
    out = jnp.dot(w2_ref[...], mid, preferred_element_type=jnp.float32)
    o_ref[...] = jnp.maximum(out + t2_ref[...], 0.0)              # (C_OUT, M_TOT)


# ------------------------------- wrapper ----------------------------------
def _fold_bn(conv_bias, gamma, beta, mean, var):
    """Fold conv bias + eval-mode BatchNorm into per-channel scale/shift."""
    scale = gamma / jnp.sqrt(var + EPS)
    shift = beta + (conv_bias - mean) * scale
    return scale.astype(jnp.float32), shift.astype(jnp.float32)


def _tap_offsets():
    offs = [(PAD, PAD)]                                    # 1x1 tap
    for d in DILATIONS:
        for ky in range(3):
            for kx in range(3):
                offs.append((PAD + (ky - 1) * d, PAD + (kx - 1) * d))
    return offs


def _build_patches_T(x_nchw):
    """(N, C_IN, H, W) -> transposed im2col matrix (KP, N*H*W) in bf16.

    Channel-major transpose is done on the 8 KiB input (not on the tap stack),
    the 28 taps are slices of the padded (C, N, Hp, Wp) array concatenated
    straight into the (128, 512) layout (tap-major / cin-minor rows), and row
    K_RAW is a constant 1 so the branch-BN shift rides inside the matmul.
    """
    x = jnp.transpose(x_nchw, (1, 0, 2, 3)).astype(jnp.bfloat16)   # (C, N, H, W)
    xp = jnp.pad(x, ((0, 0), (0, 0), (PAD, PAD), (PAD, PAD)))      # (C, N, H+10, W+10)
    taps = [xp[:, :, y0:y0 + H, x0:x0 + W].reshape(C_IN, M_TOT)
            for (y0, x0) in _tap_offsets()]                        # 28 x (4, 512)
    ones = jnp.ones((1, M_TOT), jnp.bfloat16)                      # bias row (K_RAW)
    zeros = jnp.zeros((KP - K_RAW - 1, M_TOT), jnp.bfloat16)       # pad rows
    return jnp.concatenate(taps + [ones, zeros], axis=0)           # (128, 512)


def _prep_weights(p):
    """Fuse branch convs + BN into (C_CAT, KP) bf16 (shift in column K_RAW);
    final conv + BN into (C_OUT, C_CAT) f32 + (C_OUT, 1) shift."""
    def w3(w_oihw):  # (Cmid, Cin, 3, 3) -> (Cmid, 9*Cin), tap-major / cin-minor
        return jnp.transpose(w_oihw, (0, 2, 3, 1)).reshape(C_MID, 9 * C_IN)

    s1, t1 = _fold_bn(p['conv1_b'], *p['bn1'])
    s2, t2 = _fold_bn(p['conv31_b'], *p['bn2'])
    s3, t3 = _fold_bn(p['conv32_b'], *p['bn3'])
    s4, t4 = _fold_bn(p['conv33_b'], *p['bn4'])
    s5, t5 = _fold_bn(p['conv2_b'], *p['bn5'])

    w1 = jnp.zeros((C_CAT, KP), jnp.float32)
    w1 = w1.at[0:C_MID, 0:C_IN].set(p['conv1_w'].reshape(C_MID, C_IN))
    w1 = w1.at[C_MID:2 * C_MID, C_IN:10 * C_IN].set(w3(p['conv31_w']))
    w1 = w1.at[2 * C_MID:3 * C_MID, 10 * C_IN:19 * C_IN].set(w3(p['conv32_w']))
    w1 = w1.at[3 * C_MID:4 * C_MID, 19 * C_IN:28 * C_IN].set(w3(p['conv33_w']))
    w1 = w1 * jnp.concatenate([s1, s2, s3, s4])[:, None]     # fold BN scale into rows
    # Fold BN shift into the matmul via the constant-1 patch row K_RAW.
    w1 = w1.at[:, K_RAW].set(jnp.concatenate([t1, t2, t3, t4]))
    w1 = w1.astype(jnp.bfloat16)

    w2 = p['conv2_w'].reshape(C_OUT, C_CAT) * s5[:, None]
    sh2 = t5.reshape(C_OUT, 1)
    return w1, w2, sh2


# FLOPs: 2*16*128*512 + 2*8*16*512 ; bytes: pT(bf16) + w1(bf16) + w2 + sh2 + out(f32)
_COST = pl.CostEstimate(
    flops=2 * C_CAT * KP * M_TOT + 2 * C_OUT * C_CAT * M_TOT,
    bytes_accessed=KP * M_TOT * 2 + C_CAT * KP * 2 + C_OUT * C_CAT * 4
    + C_OUT * 4 + C_OUT * M_TOT * 4,
    transcendentals=0,
)


@jax.jit
def aspp_forward(x_nchw, params):
    pT = _build_patches_T(x_nchw)
    w1, w2, sh2 = _prep_weights(params)
    vmem = pltpu.MemorySpace.VMEM

    out_T = pl.pallas_call(
        aspp_kernel,
        out_shape=jax.ShapeDtypeStruct((C_OUT, M_TOT), jnp.float32),
        in_specs=[
            pl.BlockSpec(memory_space=vmem),     # im2col patches (transposed, bf16)
            pl.BlockSpec(memory_space=vmem),     # fused branch weights (bf16)
            pl.BlockSpec(memory_space=vmem),     # fused final 1x1 weight
            pl.BlockSpec(memory_space=vmem),     # final BN shift
        ],
        out_specs=pl.BlockSpec(memory_space=vmem),
        compiler_params=pltpu.CompilerParams(
            # Let XLA fuse the pad/slice/concat im2col producer into the
            # operand DMA instead of round-tripping it through HBM.
            allow_input_fusion=[True, False, False, False],
        ),
        cost_estimate=_COST,
    )(pT, w1, w2, sh2)

    # (C_OUT, N*H*W) -> (N, C_OUT, H, W)
    return jnp.transpose(out_T.reshape(C_OUT, N, H, W), (1, 0, 2, 3))


# -------------------------- pure-JAX reference -----------------------------
def _conv2d_ref(x, w, b, dilation, padding):
    out = jax.lax.conv_general_dilated(
        x, w, window_strides=(1, 1),
        padding=((padding, padding), (padding, padding)),
        rhs_dilation=(dilation, dilation),
        dimension_numbers=('NCHW', 'OIHW', 'NCHW'))
    return out + b[None, :, None, None]


def _bn_relu_ref(x, gamma, beta, mean, var):
    y = (x - mean[None, :, None, None]) / jnp.sqrt(var[None, :, None, None] + EPS)
    y = y * gamma[None, :, None, None] + beta[None, :, None, None]
    return jnp.maximum(y, 0.0)


def aspp_ref(x, p):
    o1 = _bn_relu_ref(_conv2d_ref(x, p['conv1_w'], p['conv1_b'], 1, 0), *p['bn1'])
    o2 = _bn_relu_ref(_conv2d_ref(x, p['conv31_w'], p['conv31_b'], 2, 2), *p['bn2'])
    o3 = _bn_relu_ref(_conv2d_ref(x, p['conv32_w'], p['conv32_b'], 5, 5), *p['bn3'])
    o4 = _bn_relu_ref(_conv2d_ref(x, p['conv33_w'], p['conv33_b'], 1, 1), *p['bn4'])
    cat = jnp.concatenate([o1, o2, o3, o4], axis=1)
    return _bn_relu_ref(_conv2d_ref(cat, p['conv2_w'], p['conv2_b'], 1, 0), *p['bn5'])


# ------------------------------ param init --------------------------------
def make_params(key):
    ks = jax.random.split(key, 32)
    i = iter(range(32))
    nrm = lambda shape: 0.1 * jax.random.normal(ks[next(i)], shape, jnp.float32)

    def bn(c):
        gamma = 1.0 + 0.1 * jax.random.normal(ks[next(i)], (c,), jnp.float32)
        beta = 0.1 * jax.random.normal(ks[next(i)], (c,), jnp.float32)
        mean = 0.1 * jax.random.normal(ks[next(i)], (c,), jnp.float32)
        var = 0.5 + jax.random.uniform(ks[next(i)], (c,), jnp.float32)
        return (gamma, beta, mean, var)

    return {
        'conv1_w': nrm((C_MID, C_IN, 1, 1)), 'conv1_b': nrm((C_MID,)), 'bn1': bn(C_MID),
        'conv31_w': nrm((C_MID, C_IN, 3, 3)), 'conv31_b': nrm((C_MID,)), 'bn2': bn(C_MID),
        'conv32_w': nrm((C_MID, C_IN, 3, 3)), 'conv32_b': nrm((C_MID,)), 'bn3': bn(C_MID),
        'conv33_w': nrm((C_MID, C_IN, 3, 3)), 'conv33_b': nrm((C_MID,)), 'bn4': bn(C_MID),
        'conv2_w': nrm((C_OUT, 4 * C_MID, 1, 1)), 'conv2_b': nrm((C_OUT,)), 'bn5': bn(C_OUT),
    }


# --------------------------------- main ------------------------------------
if __name__ == "__main__":
    key = jax.random.PRNGKey(0)
    k_x, k_p = jax.random.split(key)
    x = jax.random.normal(k_x, (N, C_IN, H, W), jnp.float32)
    params = make_params(k_p)

    out = aspp_forward(x, params)
    out = jax.block_until_ready(out)

    ref = jax.block_until_ready(aspp_ref(x, params))
    assert out.shape == (N, C_OUT, H, W), out.shape
    # Tolerance relaxed to 1e-2 because patches/branch weights are bf16 on the
    # MXU (per perf review); accumulation is still f32.
    assert jnp.allclose(out, ref, atol=1e-2, rtol=1e-2), \
        f"max abs err {float(jnp.max(jnp.abs(out - ref)))}"

    print("KERNEL_OK")
</pallas_src>

<mosaic_0001>
module attributes {stable_mosaic.version = 11 : i64} {
  func.func @aspp_kernel(%arg0: memref<128x512xbf16, #tpu.memory_space<vmem>>, %arg1: memref<16x128xbf16, #tpu.memory_space<vmem>>, %arg2: memref<8x16xf32, #tpu.memory_space<vmem>>, %arg3: memref<8x1xf32, #tpu.memory_space<vmem>>, %arg4: memref<8x512xf32, #tpu.memory_space<vmem>>) attributes {dimension_semantics = [], scalar_prefetch = 0 : i64, scratch_operands = 0 : i64, tpu.core_type = #tpu.core_type<tc>} {
    %c0 = arith.constant 0 : index
    %c0_0 = arith.constant 0 : index
    %0 = vector.load %arg1[%c0, %c0_0] : memref<16x128xbf16, #tpu.memory_space<vmem>>, vector<16x128xbf16>
    %c0_1 = arith.constant 0 : index
    %c0_2 = arith.constant 0 : index
    %1 = vector.load %arg0[%c0_1, %c0_2] : memref<128x512xbf16, #tpu.memory_space<vmem>>, vector<128x512xbf16>
    %cst = arith.constant dense<0.000000e+00> : vector<16x512xf32>
    %2 = tpu.matmul %0, %1, %cst {dimension_numbers = #tpu.dot_dimension_numbers<[1], [0], [0], [1], [0, 0, 1, 1], [], []>} : vector<16x128xbf16>, vector<128x512xbf16>, vector<16x512xf32> -> vector<16x512xf32>
    %cst_3 = arith.constant 0.000000e+00 : f32
    %3 = vector.broadcast %cst_3 : f32 to vector<16x512xf32>
    %4 = arith.maximumf %2, %3 : vector<16x512xf32>
    %c0_4 = arith.constant 0 : index
    %c0_5 = arith.constant 0 : index
    %5 = vector.load %arg2[%c0_4, %c0_5] : memref<8x16xf32, #tpu.memory_space<vmem>>, vector<8x16xf32>
    %cst_6 = arith.constant dense<0.000000e+00> : vector<8x512xf32>
    %6 = tpu.matmul %5, %4, %cst_6 {dimension_numbers = #tpu.dot_dimension_numbers<[1], [0], [0], [1], [0, 0, 1, 1], [], []>} : vector<8x16xf32>, vector<16x512xf32>, vector<8x512xf32> -> vector<8x512xf32>
    %c0_7 = arith.constant 0 : index
    %c0_8 = arith.constant 0 : index
    %7 = vector.load %arg3[%c0_7, %c0_8] : memref<8x1xf32, #tpu.memory_space<vmem>>, vector<8x1xf32>
    %8 = vector.broadcast %7 : vector<8x1xf32> to vector<8x512xf32>
    %9 = arith.addf %6, %8 : vector<8x512xf32>
    %cst_9 = arith.constant 0.000000e+00 : f32
    %10 = vector.broadcast %cst_9 : f32 to vector<8x512xf32>
    %11 = arith.maximumf %9, %10 : vector<8x512xf32>
    %c0_10 = arith.constant 0 : index
    %c0_11 = arith.constant 0 : index
    %12 = vector.load %arg4[%c0_10, %c0_11] : memref<8x512xf32, #tpu.memory_space<vmem>>, vector<8x512xf32>
    tpu.vector_store %arg4[%c0_10, %c0_11], %11 {strides = array<i32>} : memref<8x512xf32, #tpu.memory_space<vmem>>, vector<8x512xf32>,
    return
  }
}

</mosaic_0001>

<bundles_post_ra>
// kernel: aspp_forward.1
= control target key start
LH: loop header
LB: loop body
LE: loop exit
PB: predicated region body
PF: predicated region fallthrough
CT: control target
= control target key end

     0   :  { %v564_v1 = vmov 0   ;;  %v565_v34 = vmov 0.0   ;;  %vm319_vm0 = vcmask 130048   ;;  %s708_s0 = inlined_call_operand.vmem [shape: bf16[128,512], index: 0, kind: input, shape index: {}]   ;;  %s709_s1 = inlined_call_operand.vmem [shape: bf16[16,128], index: 1, kind: input, shape index: {}]   ;;  %s710_s3 = inlined_call_operand.vmem [shape: f32[8,1], index: 3, kind: input, shape index: {}]   ;;  %s711_s2 = inlined_call_operand.vmem [shape: f32[8,16], index: 2, kind: input, shape index: {}]   ;;  %s712_s4 = inlined_call_operand.vmem [shape: f32[8,512], index: 4, kind: output, shape index: {}]  }
   0x1   :  { %v515_v0 = vld [vmem:[%s708_s0 + $0xe4] ss:$16 sps:$4 sm:$0xff]   ;;  %250 = vmatprep.mubr.bf16.mxu0 %v564_v1  ;;  %293 = vmatprep.mubr.bf16.mxu1 %v564_v1  ;;  %v517_v2 = vld [vmem:[%s708_s0 + $0xec] ss:$16 sps:$4 sm:$0xff]   ;;  %v519_v3 = vld [vmem:[%s708_s0 + $0xe0] ss:$16 sps:$4 sm:$0xff]  }
   0x2   :  { %514 = vset.pattern.permute.xlu0 %v564_v1  ;;  %218 = vmatprep.subr.bf16.mxu0 %v515_v0  ;;  %v520_v4 = vld [vmem:[%s708_s0 + $0xe8] ss:$16 sps:$4 sm:$0xff]   ;;  %v521_v5 = vld [vmem:[%s708_s0 + $0xc4] ss:$16 sps:$4 sm:$0xff]   ;;  %v523_v6 = vld [vmem:[%s708_s0 + $0xcc] ss:$16 sps:$4 sm:$0xff]  }
   0x3   :  { %261 = vmatprep.subr.bf16.mxu1 %v517_v2  ;;  %219 = vmatpush1.bf16.msra.mxu0 %v519_v3  ;;  %v525_v7 = vld [vmem:[%s708_s0 + $0xc0] ss:$16 sps:$4 sm:$0xff]   ;;  %v526_v8 = vld [vmem:[%s708_s0 + $0xc8] ss:$16 sps:$4 sm:$0xff]   ;;  %v527_v9 = vld [vmem:[%s708_s0 + $0xa4] ss:$16 sps:$4 sm:$0xff]  }
   0x4   :  { %262 = vmatpush1.bf16.msra.mxu1 %v520_v4  ;;  %220 = vmatprep.subr.bf16.mxu0 %v521_v5  ;;  %v529_v10 = vld [vmem:[%s708_s0 + $0xac] ss:$16 sps:$4 sm:$0xff]   ;;  %v531_v11 = vld [vmem:[%s708_s0 + $0xa0] ss:$16 sps:$4 sm:$0xff]   ;;  %v532_v12 = vld [vmem:[%s708_s0 + $0xa8] ss:$16 sps:$4 sm:$0xff]  }
   0x5   :  { %263 = vmatprep.subr.bf16.mxu1 %v523_v6  ;;  %v533_v13 = vld [vmem:[%s708_s0 + $0x84] ss:$16 sps:$4 sm:$0xff]   ;;  %v535_v14 = vld [vmem:[%s708_s0 + $0x8c] ss:$16 sps:$4 sm:$0xff]   ;;  %v537_v15 = vld [vmem:[%s708_s0 + $0x80] ss:$16 sps:$4 sm:$0xff]  }
   0x6   :  { %v538_v16 = vld [vmem:[%s708_s0 + $0x88] ss:$16 sps:$4 sm:$0xff]   ;;  %v539_v17 = vld [vmem:[%s708_s0 + $0x64] ss:$16 sps:$4 sm:$0xff]   ;;  %v541_v18 = vld [vmem:[%s708_s0 + $0x6c] ss:$16 sps:$4 sm:$0xff]  }
   0x7   :  { %221 = vmatpush1.bf16.msra.mxu0 %v525_v7  ;;  %v543_v19 = vld [vmem:[%s708_s0 + $0x60] ss:$16 sps:$4 sm:$0xff]   ;;  %v544_v20 = vld [vmem:[%s708_s0 + $0x68] ss:$16 sps:$4 sm:$0xff]   ;;  %v545_v21 = vld [vmem:[%s708_s0 + $0x44] ss:$16 sps:$4 sm:$0xff]  }
   0x8   :  { %264 = vmatpush1.bf16.msra.mxu1 %v526_v8  ;;  %222 = vmatprep.subr.bf16.mxu0 %v527_v9  ;;  %v547_v22 = vld [vmem:[%s708_s0 + $0x4c] ss:$16 sps:$4 sm:$0xff]   ;;  %v549_v23 = vld [vmem:[%s708_s0 + $0x40] ss:$16 sps:$4 sm:$0xff]   ;;  %v550_v24 = vld [vmem:[%s708_s0 + $0x48] ss:$16 sps:$4 sm:$0xff]  }
   0x9   :  { %265 = vmatprep.subr.bf16.mxu1 %v529_v10  ;;  %v551_v25 = vld [vmem:[%s708_s0 + $0x24] ss:$16 sps:$4 sm:$0xff]   ;;  %v553_v26 = vld [vmem:[%s708_s0 + $0x2c] ss:$16 sps:$4 sm:$0xff]   ;;  %v555_v27 = vld [vmem:[%s708_s0 + $0x20] ss:$16 sps:$4 sm:$0xff]  }
   0xa   :  { %v556_v28 = vld [vmem:[%s708_s0 + $0x28] ss:$16 sps:$4 sm:$0xff]   ;;  %v557_v29 = vld [vmem:[%s708_s0 + $0x4] ss:$16 sps:$4 sm:$0xff]   ;;  %v559_v30 = vld [vmem:[%s708_s0 + $0xc] ss:$16 sps:$4 sm:$0xff]  }
   0xb   :  { %223 = vmatpush1.bf16.msra.mxu0 %v531_v11  ;;  %v561_v31 = vld [vmem:[%s708_s0] ss:$16 sps:$4 sm:$0xff]   ;;  %v562_v32 = vld [vmem:[%s708_s0 + $0x8] ss:$16 sps:$4 sm:$0xff]  }
   0xc   :  { %266 = vmatpush1.bf16.msra.mxu1 %v532_v12  ;;  %224 = vmatprep.subr.bf16.mxu0 %v533_v13  ;;  %v563_v33 = vld [vmem:[%s709_s1] sm:$0xff]  }
   0xd   :  { %267 = vmatprep.subr.bf16.mxu1 %v535_v14  ;;  %v313_v35 = vld [vmem:[%s710_s3] sm:$0xff] }
   0xe   :  { %316 = vperm.xlu0 %514, %v313_v35   ;;  %v312_v52 = vld [vmem:[%s711_s2] sm:$0xff] }
   0xf   :  { %225 = vmatpush1.bf16.msra.mxu0 %v537_v15 }
  0x10   :  { %268 = vmatpush1.bf16.msra.mxu1 %v538_v16  ;;  %226 = vmatprep.subr.bf16.mxu0 %v539_v17 }
  0x11   :  { %269 = vmatprep.subr.bf16.mxu1 %v541_v18 }
  0x13   :  { %227 = vmatpush1.bf16.msra.mxu0 %v543_v19 }
  0x14   :  { %270 = vmatpush1.bf16.msra.mxu1 %v544_v20  ;;  %228 = vmatprep.subr.bf16.mxu0 %v545_v21 }
  0x15   :  { %271 = vmatprep.subr.bf16.mxu1 %v547_v22 }
  0x17   :  { %229 = vmatpush1.bf16.msra.mxu0 %v549_v23 }
  0x18   :  { %272 = vmatpush1.bf16.msra.mxu1 %v550_v24  ;;  %230 = vmatprep.subr.bf16.mxu0 %v551_v25 }
  0x19   :  { %273 = vmatprep.subr.bf16.mxu1 %v553_v26 }
  0x1b   :  { %231 = vmatpush1.bf16.msra.mxu0 %v555_v27 }
  0x1c   :  { %274 = vmatpush1.bf16.msra.mxu1 %v556_v28  ;;  %232 = vmatprep.subr.bf16.mxu0 %v557_v29 }
  0x1d   :  { %275 = vmatprep.subr.bf16.mxu1 %v559_v30 }
  0x1f   :  { %233 = vmatpush1.bf16.msra.mxu0 %v561_v31 }
  0x20   :  { %276 = vmatpush1.bf16.msra.mxu1 %v562_v32 }
  0x22   :  { %251 = vmatmul.mubr.bf16.vlgmr.msra.gmra.mxu0 %v563_v33 }
  0x23   :  { %294 = vmatmul.mubr.bf16.vlgmr.msra.gmra.mxu1 %v563_v33  ;;  %387 = vmatprep.mubr.f32.mxu0 %v565_v34 }
  0x24   :  { %458 = vmatprep.mubr.f32.mxu1 %v565_v34 }
  0x89   :  { %v317_v53 = vpop.permute.xlu0 %316 }
  0xe2   :  { %v252_v36 = vpop.f32.mrf.mxu0 }
  0xe3   :  { %v295_v37 = vpop.f32.mrf.mxu1  ;;  %v304_v50 = vmax.f32 %v252_v36, 0.0 }
  0xe4   :  { %v254_v38 = vpop.f32.mrf.mxu0  ;;  %v306_v51 = vmax.f32 %v295_v37, 0.0 }
  0xe5   :  { %v297_v39 = vpop.f32.mrf.mxu1  ;;  %v305_v48 = vmax.f32 %v254_v38, 0.0 }
  0xe6   :  { %v256_v40 = vpop.f32.mrf.mxu0  ;;  %v307_v49 = vmax.f32 %v297_v39, 0.0 }
  0xe7   :  { %v299_v41 = vpop.f32.mrf.mxu1  ;;  %v308_v46 = vmax.f32 %v256_v40, 0.0 }
  0xe8   :  { %v258_v42 = vpop.f32.mrf.mxu0  ;;  %v310_v47 = vmax.f32 %v299_v41, 0.0 }
  0xe9   :  { %v301_v43 = vpop.f32.mrf.mxu1  ;;  %v309_v44 = vmax.f32 %v258_v42, 0.0 }
  0xea   :  { %v311_v45 = vmax.f32 %v301_v43, 0.0 }
  0xeb   :  { %351 = vmatprep.subr.mxu0 %v309_v44 }
  0xec   :  { %422 = vmatprep.subr.mxu1 %v311_v45  ;;  %352 = vmatpush1.msra.mxu0 %v308_v46 }
  0xed   :  { %423 = vmatpush1.msra.mxu1 %v310_v47  ;;  %353 = vmatprep.subr.mxu0 %v305_v48 }
  0xee   :  { %424 = vmatprep.subr.mxu1 %v307_v49  ;;  %354 = vmatpush1.msra.mxu0 %v304_v50 }
  0xef   :  { %425 = vmatpush1.msra.mxu1 %v306_v51  ;;  %510 = vmatmul.mubr.msk.f32.vlgmr.msra.gmra.mxu0 %vm319_vm0, %v312_v52 }
  0xf0   :  { %511 = vmatmul.mubr.msk.f32.vlgmr.msra.gmra.mxu1 %vm319_vm0, %v312_v52 }
 0x1af   :  { %v389_v54 = vpop.f32.mrf.mxu0 }
 0x1b0   :  { %v460_v55 = vpop.f32.mrf.mxu1  ;;  %v390_v56 = vadd.f32 %v389_v54, %v317_v53 }
 0x1b1   :  { %v461_v57 = vadd.f32 %v460_v55, %v317_v53  ;;  %v391_v58 = vpop.f32.mrf.mxu0 }
 0x1b2   :  { %v462_v59 = vpop.f32.mrf.mxu1  ;;  %v465_v60 = vmax.f32 %v390_v56, 0.0  ;;  %v392_v62 = vadd.f32 %v391_v58, %v317_v53 }
 0x1b3   :  { %v467_v61 = vmax.f32 %v461_v57, 0.0  ;;  %v463_v63 = vadd.f32 %v462_v59, %v317_v53 }
 0x1b4   :  { %469 = vst [vmem:[%s712_s4] sm:$0xff] %v465_v60  ;;  %v466_v0 = vmax.f32 %v392_v62, 0.0 }
 0x1b5   :  { %471 = vst [vmem:[%s712_s4 + $0x10] sm:$0xff] %v467_v61  ;;  %v468_v1 = vmax.f32 %v463_v63, 0.0 }
 0x1b6   :  { %470 = vst [vmem:[%s712_s4 + $0x8] sm:$0xff] %v466_v0 }
 0x1b7   :  { %472 = vst [vmem:[%s712_s4 + $0x18] sm:$0xff] %v468_v1 }

</bundles_post_ra>
